<compile_context>
chip_gen: v6e
topology: v6e:2x2x1
jax: 0.10.0
libtpu: 0.0.40
codegen_flags: <defaults>
</compile_context>

<pallas_src>
from functools import partial

import jax
import jax.numpy as jnp
import numpy as np
from jax.experimental import pallas as pl
from jax.experimental.pallas import tpu as pltpu

WBIT = 8      # weight bits  (wbit)
ABIT = 8      # activation bits (abit)
SIGMA = 12.0  # args.sigma set in Quantizer.__init__


def _round_up(x, m):
    return (x + m - 1) // m * m


def _cdiv(a, b):
    return -(-a // b)


# ----------------------------------------------------------------------------
# Init-time statistics (Quantizer._init_quant_para runs once) — plain-JAX glue
# ----------------------------------------------------------------------------
def _activation_quant_params(x):
    """Per-tensor asymmetric quant params for the input (sigma clipping)."""
    xf = x.astype(jnp.float32)
    is_signed = jnp.min(xf) < 0
    # torch: data.std() if signed else data[data > 0].std()   (unbiased, ddof=1)
    std_all = jnp.std(xf, ddof=1)
    pos = xf > 0
    cnt = jnp.sum(pos.astype(jnp.float32))
    mean_p = jnp.sum(jnp.where(pos, xf, 0.0)) / jnp.maximum(cnt, 1.0)
    var_p = jnp.sum(jnp.where(pos, (xf - mean_p) ** 2, 0.0)) / jnp.maximum(cnt - 1.0, 1.0)
    std_p = jnp.sqrt(var_p)
    # NOTE: unsigned-classified input with no positive elements degenerates to
    # sigma~0 (guarded by max(cnt,1) and the 1e-8 scale clamp), mirroring the
    # torch module's nan-prone corner case as closely as possible.
    sigma = jnp.where(is_signed, std_all, std_p)
    alpha = jnp.where(is_signed, SIGMA * sigma / 1.25, SIGMA * sigma)
    x_min = jnp.where(is_signed, -alpha, 0.0)
    x_max = alpha
    n_levels = 2.0 ** ABIT - 1.0
    scale = n_levels / jnp.maximum(x_max - x_min, 1e-8)
    zp = jnp.round(scale * x_min) + 2.0 ** (ABIT - 1)   # integer, in {0, 128}
    return scale, zp


def _activation_shifted_codes(x, a_scale, a_zp):
    """Shifted activation codes (q_a + zp_a): integers in [-128,255], bf16-exact."""
    n = 2.0 ** (ABIT - 1)
    q = jnp.clip(jnp.round(a_scale * x.astype(jnp.float32) - a_zp), -n, n - 1.0)
    return (q + a_zp).astype(jnp.bfloat16)


def _weight_quant_codes(w, a_scale, O_pad, C_pad):
    """Per-output-channel asymmetric weight quant ('basic': plain round).

    Returns centered bf16 codes q_w in [-128,127] laid out (O_pad, K*C_pad)
    (tap-major / channel-minor, matching the in-kernel im2col), plus the
    per-channel zero point zp_w and fused dequant scale 1/(s_w*s_a), each
    (O_pad, 1).  Centered codes are always bf16-exact (no zero-crossing
    assumption); the zp term is restored in-kernel as zp_w * colsum(codes).
    """
    O, C, K = w.shape
    w2d = w.reshape(O, -1).astype(jnp.float32)
    wmax = jnp.max(w2d, axis=1, keepdims=True)
    wmin = jnp.min(w2d, axis=1, keepdims=True)
    n_levels = 2.0 ** WBIT - 1.0
    sw = n_levels / jnp.maximum(wmax - wmin, 1e-8)
    zpw = jnp.round(sw * wmin) + 2.0 ** (WBIT - 1)
    n = 2.0 ** (WBIT - 1)
    qw = jnp.clip(jnp.round(sw * w2d - zpw), -n, n - 1.0)      # centered codes
    qw_okc = jnp.transpose(qw.reshape(O, C, K), (0, 2, 1))     # (O, K, C)
    qw_pad = jnp.zeros((O_pad, K, C_pad), jnp.bfloat16)
    qw_pad = qw_pad.at[:O, :, :C].set(qw_okc.astype(jnp.bfloat16))
    qw_flat = qw_pad.reshape(O_pad, K * C_pad)                 # bf16 codes -> HBM
    zpw_pad = jnp.zeros((O_pad, 1), jnp.float32).at[:O].set(zpw)
    deq_pad = jnp.zeros((O_pad, 1), jnp.float32).at[:O].set(1.0 / (sw * a_scale))
    return qw_flat, zpw_pad, deq_pad


# ----------------------------------------------------------------------------
# Fused kernel: im2col + single integer-code matmul + zp correction + dequant
# ----------------------------------------------------------------------------
def _conv1d_kernel(x_ref, w_ref, zpw_ref, deq_ref, b_ref, o_ref, *, K, NB, TL):
    """One (batch-block, L_out-tile) step.

    x_ref : (NB, 1, C_pad, TL+K-1) bf16 shifted activation codes (q_a + zp_a)
    w_ref : (O_pad, K*C_pad)       bf16 centered weight codes q_w
    zpw/deq/b : (O_pad, 1) f32 per-channel zero point / 1/(s_w*s_a) / bias
    o_ref : (1, 1, O_pad, NB*TL)   f32 lane-dense output slab
    """
    w = w_ref[...]
    zpw = zpw_ref[...]
    deq = deq_ref[...]
    bias = b_ref[...]

    cols, sums = [], []
    for bb in range(NB):                         # static; feeds ONE dot below
        xb = x_ref[bb, 0]                        # (C_pad, TL+K-1)
        # im2col, tap-major / channel-minor: row k*C_pad + c holds xb[c, k + l]
        cols.append(jnp.concatenate([xb[:, k:k + TL] for k in range(K)], axis=0))
        # column sums of the shifted codes (zero-point correction term)
        ch = jnp.sum(xb.astype(jnp.float32), axis=0, keepdims=True)   # (1, TL+K-1)
        s = ch[:, 0:TL]
        for k in range(1, K):
            s = s + ch[:, k:k + TL]
        sums.append(s)                           # (1, TL)
    im2col = cols[0] if NB == 1 else jnp.concatenate(cols, axis=1)    # (K*C_pad, NB*TL)
    colsum = sums[0] if NB == 1 else jnp.concatenate(sums, axis=1)    # (1, NB*TL)

    # bf16 code products, f32 accumulation: products are exact integers; for
    # very large K*C the accumulation order may differ from the f32 reference
    # in the last bits only (well inside 1e-3 tolerance).
    acc = jnp.dot(w, im2col, preferred_element_type=jnp.float32)      # (O_pad, NB*TL)
    o_ref[0, 0] = (acc + zpw * colsum) * deq + bias


def conv1d_quantizer_forward(x, w, b=None, *, block_n=8):
    """Conv1dQuantizer.forward for mode='basic', flipping=False."""
    N, C, L = x.shape
    O, _, K = w.shape
    L_out = L - K + 1
    assert L_out >= 1
    if b is None:
        b = jnp.zeros((O,), jnp.float32)

    # ---- aligned extents ----
    C_pad = _round_up(C, 16)      # bf16 sublane packing: aligned im2col tap blocks
    O_pad = _round_up(O, 8)       # f32 output sublanes: unmasked result stores
    F = K * C_pad

    # ---- generation-aware VMEM budget ----
    try:
        vmem_cap = int(pltpu.get_tpu_info().vmem_capacity_bytes)
    except Exception:
        vmem_cap = 64 << 20       # conservative fallback = v7x per-TC capacity
    vmem_limit = min(int(vmem_cap * 0.6), 72 << 20)
    block_budget = min(int(vmem_cap * 0.45), 40 << 20)

    def _step_bytes(nb, tl):
        l_in = tl + K - 1
        x_blk = nb * C_pad * l_in * 2              # bf16 activation codes
        out_blk = O_pad * nb * tl * 4              # f32 output slab
        w_blk = O_pad * F * 2                      # bf16 weight codes
        small = 3 * max(8, O_pad) * 128 * 4        # zpw/deq/bias (padded layout)
        im2col = F * nb * tl * 2                   # bf16 im2col intermediate
        acc = O_pad * nb * tl * 4                  # f32 matmul accumulator
        casts = nb * C_pad * l_in * 4              # f32 cast feeding colsum
        # pipelined operands are double-buffered; intermediates single-copy
        return 2 * (x_blk + out_blk + w_blk + small) + im2col + acc + casts

    # ---- pick (NB, TL): prefer L tiling over shrinking the batch block ----
    NB = max(1, min(block_n, N))
    TL = _round_up(L_out, 128)                     # lane-dense output tiles
    while _step_bytes(NB, TL) > block_budget:
        if TL > 512:
            TL = _round_up(TL // 2, 128)
        elif NB > 1:
            NB //= 2
        elif TL > 128:
            TL = _round_up(TL // 2, 128)
        else:
            break
    # TODO(synk): for very large O or K*C also tile the output-channel axis.
    N_pad = _round_up(N, NB)
    num_L = _cdiv(L_out, TL)
    # keep >= 2 grid steps so both v7x TensorCores get work (harmless on 1-TC chips)
    if (N_pad // NB) * num_L < 2:
        if NB > 1:
            NB //= 2
            N_pad = _round_up(N, NB)
        elif TL >= 256:
            TL = _round_up(TL // 2, 128)
            num_L = _cdiv(L_out, TL)
    Gn = N_pad // NB
    L_tile_in = TL + K - 1

    # ---- init-time quant statistics + code emission (plain-JAX glue) ----
    a_scale, a_zp = _activation_quant_params(x)
    codes = _activation_shifted_codes(x, a_scale, a_zp)              # (N, C, L) bf16
    qw_flat, zpw_pad, deq_pad = _weight_quant_codes(w, a_scale, O_pad, C_pad)
    b_pad = jnp.zeros((O_pad, 1), jnp.float32).at[:O, 0].set(b.astype(jnp.float32))

    # Padded batch rows / channels / length positions hold raw-zero codes; they
    # only contribute to output columns >= L_out inside a tile, to padded output
    # channels (zero weight codes) or to padded batch rows — all sliced off below.
    L_needed = num_L * TL + K - 1
    xq = jnp.zeros((N_pad, C_pad, L_needed), jnp.bfloat16)
    xq = xq.at[:N, :C, :L].set(codes)
    if num_L == 1:
        x_tiles = xq[:, None, :, :]                                  # reshape only
    else:
        x_tiles = jnp.stack(
            [xq[:, :, j * TL: j * TL + L_tile_in] for j in range(num_L)], axis=1)
    # x_tiles: (N_pad, num_L, C_pad, L_tile_in) — only bf16 codes cross HBM.

    out = pl.pallas_call(
        partial(_conv1d_kernel, K=K, NB=NB, TL=TL),
        out_shape=jax.ShapeDtypeStruct((Gn, num_L, O_pad, NB * TL), jnp.float32),
        grid=(Gn, num_L),
        in_specs=[
            pl.BlockSpec((NB, 1, C_pad, L_tile_in), lambda i, j: (i, j, 0, 0)),
            pl.BlockSpec((O_pad, F), lambda i, j: (0, 0)),      # weight codes
            pl.BlockSpec((O_pad, 1), lambda i, j: (0, 0)),      # weight zero point
            pl.BlockSpec((O_pad, 1), lambda i, j: (0, 0)),      # 1/(s_w * s_a)
            pl.BlockSpec((O_pad, 1), lambda i, j: (0, 0)),      # bias
        ],
        out_specs=pl.BlockSpec((1, 1, O_pad, NB * TL), lambda i, j: (i, j, 0, 0)),
        compiler_params=pltpu.CompilerParams(
            dimension_semantics=("parallel", "parallel"),
            vmem_limit_bytes=vmem_limit),
    )(x_tiles, qw_flat, zpw_pad, deq_pad, b_pad)
    # TODO(synk): single-buffer the grid-invariant operands (weight/zp/deq/bias)
    # via pipeline_mode=pl.Buffered(1) once verified on the target jax version.

    # (Gn, num_L, O_pad, NB*TL) -> (N, O, L_out)
    out = out.reshape(Gn, num_L, O_pad, NB, TL)
    out = jnp.transpose(out, (0, 3, 2, 1, 4)).reshape(N_pad, O_pad, num_L * TL)
    return out[:N, :O, :L_out]


# ----------------------------------------------------------------------------
# Pure-JAX reference (fake-quant then f32 conv, same math as the torch module)
# ----------------------------------------------------------------------------
def reference(x, w, b):
    O, C, K = w.shape
    # weight fake-quant (per output channel)
    w2d = w.reshape(O, -1)
    wmax = w2d.max(axis=1, keepdims=True)
    wmin = w2d.min(axis=1, keepdims=True)
    nl = 2.0 ** WBIT - 1.0
    sw = nl / jnp.maximum(wmax - wmin, 1e-8)
    zpw = jnp.round(sw * wmin) + 2.0 ** (WBIT - 1)
    n = 2.0 ** (WBIT - 1)
    qw = jnp.clip(jnp.round(sw * w2d - zpw), -n, n - 1.0)
    wq = ((qw + zpw) / sw).reshape(O, C, K)
    # activation fake-quant (per tensor)
    a_scale, a_zp = _activation_quant_params(x)
    na = 2.0 ** (ABIT - 1)
    xq = (jnp.clip(jnp.round(a_scale * x - a_zp), -na, na - 1.0) + a_zp) / a_scale
    # conv1d
    out = jax.lax.conv_general_dilated(
        xq, wq, window_strides=(1,), padding="VALID",
        dimension_numbers=("NCH", "OIH", "NCH"),
        precision=jax.lax.Precision.HIGHEST)
    return out + b.reshape(1, O, 1)


if __name__ == "__main__":
    key = jax.random.PRNGKey(0)
    k1, k2, k3 = jax.random.split(key, 3)
    N, C, L, O, K = 2, 4, 16, 8, 3
    x = jax.random.normal(k1, (N, C, L), jnp.float32)
    w = jax.random.normal(k2, (O, C, K), jnp.float32) * 0.5
    b = jax.random.normal(k3, (O,), jnp.float32) * 0.1

    out = conv1d_quantizer_forward(x, w, b)
    jax.block_until_ready(out)

    ref = reference(x, w, b)
    np.testing.assert_allclose(np.asarray(out), np.asarray(ref),
                               rtol=1e-3, atol=1e-3)
    print("KERNEL_OK")
</pallas_src>

<mosaic_0001>
module attributes {stable_mosaic.version = 11 : i64} {
  func.func @_conv1d_kernel(%arg0: i32, %arg1: i32, %arg2: memref<1x1x16x130xbf16, #tpu.memory_space<vmem>>, %arg3: memref<8x48xbf16, #tpu.memory_space<vmem>>, %arg4: memref<8x1xf32, #tpu.memory_space<vmem>>, %arg5: memref<8x1xf32, #tpu.memory_space<vmem>>, %arg6: memref<8x1xf32, #tpu.memory_space<vmem>>, %arg7: memref<1x1x8x128xf32, #tpu.memory_space<vmem>>) attributes {dimension_semantics = [#tpu.dimension_semantics<parallel>, #tpu.dimension_semantics<parallel>], iteration_bounds = array<i64: 2, 1>, scalar_prefetch = 0 : i64, scratch_operands = 0 : i64, tpu.core_type = #tpu.core_type<tc>, window_params = [{transform_indices = @transform_0, window_bounds = array<i64: 1, 1, 16, 130>}, {pipeline_mode = #tpu.pipeline_mode<synchronous>, transform_indices = @transform_1, window_bounds = array<i64: 8, 48>}, {pipeline_mode = #tpu.pipeline_mode<synchronous>, transform_indices = @transform_2, window_bounds = array<i64: 8, 1>}, {pipeline_mode = #tpu.pipeline_mode<synchronous>, transform_indices = @transform_3, window_bounds = array<i64: 8, 1>}, {pipeline_mode = #tpu.pipeline_mode<synchronous>, transform_indices = @transform_4, window_bounds = array<i64: 8, 1>}, {transform_indices = @transform_5, window_bounds = array<i64: 1, 1, 8, 128>}]} {
    %c0 = arith.constant 0 : index
    %c0_0 = arith.constant 0 : index
    %0 = vector.load %arg3[%c0, %c0_0] : memref<8x48xbf16, #tpu.memory_space<vmem>>, vector<8x48xbf16>
    %c0_1 = arith.constant 0 : index
    %c0_2 = arith.constant 0 : index
    %1 = vector.load %arg4[%c0_1, %c0_2] : memref<8x1xf32, #tpu.memory_space<vmem>>, vector<8x1xf32>
    %c0_3 = arith.constant 0 : index
    %c0_4 = arith.constant 0 : index
    %2 = vector.load %arg5[%c0_3, %c0_4] : memref<8x1xf32, #tpu.memory_space<vmem>>, vector<8x1xf32>
    %c0_5 = arith.constant 0 : index
    %c0_6 = arith.constant 0 : index
    %3 = vector.load %arg6[%c0_5, %c0_6] : memref<8x1xf32, #tpu.memory_space<vmem>>, vector<8x1xf32>
    %c0_7 = arith.constant 0 : index
    %c0_8 = arith.constant 0 : index
    %c0_9 = arith.constant 0 : index
    %c0_10 = arith.constant 0 : index
    %4 = vector.load %arg2[%c0_7, %c0_8, %c0_9, %c0_10] : memref<1x1x16x130xbf16, #tpu.memory_space<vmem>>, vector<1x1x16x130xbf16>
    %5 = vector.shape_cast %4 : vector<1x1x16x130xbf16> to vector<16x130xbf16>
    %6 = vector.extract_strided_slice %5 {offsets = [0, 0], sizes = [16, 128], strides = [1, 1]} : vector<16x130xbf16> to vector<16x128xbf16>
    %7 = vector.extract_strided_slice %5 {offsets = [0, 1], sizes = [16, 128], strides = [1, 1]} : vector<16x130xbf16> to vector<16x128xbf16>
    %8 = vector.extract_strided_slice %5 {offsets = [0, 2], sizes = [16, 128], strides = [1, 1]} : vector<16x130xbf16> to vector<16x128xbf16>
    %9 = tpu.concatenate %6, %7, %8 in 0 : vector<16x128xbf16>, vector<16x128xbf16>, vector<16x128xbf16> -> vector<48x128xbf16>
    %10 = arith.extf %5 : vector<16x130xbf16> to vector<16x130xf32>
    %cst = arith.constant dense<0.000000e+00> : vector<130xf32>
    %11 = vector.multi_reduction <add>, %10, %cst [0] : vector<16x130xf32> to vector<130xf32>
    %12 = vector.shape_cast %11 : vector<130xf32> to vector<1x130xf32>
    %13 = vector.extract_strided_slice %12 {offsets = [0, 0], sizes = [1, 128], strides = [1, 1]} : vector<1x130xf32> to vector<1x128xf32>
    %14 = vector.extract_strided_slice %12 {offsets = [0, 1], sizes = [1, 128], strides = [1, 1]} : vector<1x130xf32> to vector<1x128xf32>
    %15 = arith.addf %13, %14 : vector<1x128xf32>
    %16 = vector.extract_strided_slice %12 {offsets = [0, 2], sizes = [1, 128], strides = [1, 1]} : vector<1x130xf32> to vector<1x128xf32>
    %17 = arith.addf %15, %16 : vector<1x128xf32>
    %cst_11 = arith.constant dense<0.000000e+00> : vector<8x128xf32>
    %18 = tpu.matmul %0, %9, %cst_11 {dimension_numbers = #tpu.dot_dimension_numbers<[1], [0], [0], [1], [0, 0, 1, 1], [], []>} : vector<8x48xbf16>, vector<48x128xbf16>, vector<8x128xf32> -> vector<8x128xf32>
    %19 = vector.broadcast %1 : vector<8x1xf32> to vector<8x128xf32>
    %20 = vector.broadcast %17 : vector<1x128xf32> to vector<8x128xf32>
    %21 = arith.mulf %19, %20 : vector<8x128xf32>
    %22 = arith.addf %18, %21 : vector<8x128xf32>
    %23 = vector.broadcast %2 : vector<8x1xf32> to vector<8x128xf32>
    %24 = arith.mulf %22, %23 : vector<8x128xf32>
    %25 = vector.broadcast %3 : vector<8x1xf32> to vector<8x128xf32>
    %26 = arith.addf %24, %25 : vector<8x128xf32>
    %c0_12 = arith.constant 0 : index
    %c0_13 = arith.constant 0 : index
    %c0_14 = arith.constant 0 : index
    %c0_15 = arith.constant 0 : index
    %27 = vector.load %arg7[%c0_12, %c0_13, %c0_14, %c0_15] : memref<1x1x8x128xf32, #tpu.memory_space<vmem>>, vector<1x1x8x128xf32>
    %28 = vector.shape_cast %27 : vector<1x1x8x128xf32> to vector<8x128xf32>
    %29 = vector.shape_cast %26 : vector<8x128xf32> to vector<1x1x8x128xf32>
    tpu.vector_store %arg7[%c0_12, %c0_13, %c0_14, %c0_15], %29 {strides = array<i32>} : memref<1x1x8x128xf32, #tpu.memory_space<vmem>>, vector<1x1x8x128xf32>,
    return
  }
  func.func @transform_0(%arg0: i32, %arg1: i32) -> (i32, i32, i32, i32) {
    %c0_i32 = arith.constant 0 : i32
    %c0_i32_0 = arith.constant 0 : i32
    %c0_i32_1 = arith.constant 0 : i32
    return %arg0, %arg1, %c0_i32, %c0_i32_0 : i32, i32, i32, i32
  }
  func.func @transform_1(%arg0: i32, %arg1: i32) -> (i32, i32) {
    %c0_i32 = arith.constant 0 : i32
    %c0_i32_0 = arith.constant 0 : i32
    %c0_i32_1 = arith.constant 0 : i32
    return %c0_i32, %c0_i32_0 : i32, i32
  }
  func.func @transform_2(%arg0: i32, %arg1: i32) -> (i32, i32) {
    %c0_i32 = arith.constant 0 : i32
    %c0_i32_0 = arith.constant 0 : i32
    %c0_i32_1 = arith.constant 0 : i32
    return %c0_i32, %c0_i32_0 : i32, i32
  }
  func.func @transform_3(%arg0: i32, %arg1: i32) -> (i32, i32) {
    %c0_i32 = arith.constant 0 : i32
    %c0_i32_0 = arith.constant 0 : i32
    %c0_i32_1 = arith.constant 0 : i32
    return %c0_i32, %c0_i32_0 : i32, i32
  }
  func.func @transform_4(%arg0: i32, %arg1: i32) -> (i32, i32) {
    %c0_i32 = arith.constant 0 : i32
    %c0_i32_0 = arith.constant 0 : i32
    %c0_i32_1 = arith.constant 0 : i32
    return %c0_i32, %c0_i32_0 : i32, i32
  }
  func.func @transform_5(%arg0: i32, %arg1: i32) -> (i32, i32, i32, i32) {
    %c0_i32 = arith.constant 0 : i32
    %c0_i32_0 = arith.constant 0 : i32
    %c0_i32_1 = arith.constant 0 : i32
    return %arg0, %arg1, %c0_i32, %c0_i32_0 : i32, i32, i32, i32
  }
}

</mosaic_0001>

<bundles_post_ra>
// kernel: tpu_custom_call.1
= control target key start
LH: loop header
LB: loop body
LE: loop exit
PB: predicated region body
PF: predicated region fallthrough
CT: control target
= control target key end

     0   :  { %10 = vsyncpa [#allocation3], 0  ;;  %s909_s0 = inlined_call_operand.hbm [shape: bf16[2,1,16,130], index: 0, kind: input, shape index: {}]   ;;  %s910_s1 = inlined_call_operand.vmem [shape: bf16[8,48], index: 1, kind: input, shape index: {}]   ;;  %s911_s2 = inlined_call_operand.vmem [shape: f32[8,1], index: 2, kind: input, shape index: {}]   ;;  %s912_s3 = inlined_call_operand.vmem [shape: f32[8,1], index: 3, kind: input, shape index: {}]   ;;  %s913_s4 = inlined_call_operand.vmem [shape: f32[8,1], index: 4, kind: input, shape index: {}]   ;;  %s914_s5 = inlined_call_operand.hbm [shape: f32[2,1,8,128], index: 5, kind: output, shape index: {}]  }
   0x1   :  { %12 = vsyncpa [#allocation3 + $0x1], 0 }
   0x2   :  { %13 = vsyncpa [#allocation4], 0 }
   0x3   :  { %15 = vsyncpa [#allocation4 + $0x1], 0  ;;  %s748_s18 = smov 0   ;;  %s750_s19 = smov 0  }
   0x4   :  { %s752_s20 = smov 0   ;;  %s754_s21 = smov 0  }
   0x5   :  { %s756_s22 = smov 0   ;;  %s758_s23 = smov 0  }
   0x6 LB: > { %s494_s24 = sadd.s32 4294967295, %s707_s23   ;;  %s495_s25 = sadd.s32 4294967294, %s707_s23   ;;  %s707_s23 = sphi %s758_s23, %s21_s23   ;;  %s703_s22 = sphi %s756_s22, %s925_s22   ;;  %s699_s21 = sphi %s754_s21, %s924_s21   ;;  %s695_s20 = sphi %s752_s20, %s923_s20   ;;  %s691_s19 = sphi %s750_s19, %s922_s19   ;;  %s687_s18 = sphi %s748_s18, %s921_s18  }
   0x7   : > { %s33_s26 = sadd.s32 1, %s703_s22  ;;  %s42_s27 = sadd.s32 1, %s695_s20 }
   0x8   : > { %p35_p0 = scmp.ge.s32.totalorder %s33_s26, 2  ;;  %p49_p1 = scmp.ne.s32.totalorder %s695_s20, %s691_s19 }
   0x9   : > { %p50_p2 = scmp.eq.s32.totalorder %s707_s23, 0  ;;  %p55_p3 = scmp.ne.s32.totalorder %s691_s19, %s687_s18 }
   0xa   : > { %s927_s26 = smov (%p35_p0, %s33_s26), 0  ;;  %p56_p5 = scmp.eq.s32.totalorder %s494_s24, 0 }
   0xb   : > { %p789_p4 = por %p50_p2, %p49_p1  ;;  %s37_s29 = ssub.s32 %s703_s22, %s927_s26 }
   0xc   : > { %p165_p6 = scmp.eq.s32.totalorder %s494_s24, 1  ;;  %p40_p7 = scmp.eq.s32.totalorder %s37_s29, 0 }
   0xd   : > { %p795_p8 = por %p56_p5, %p55_p3  ;;  %p171_p10 = scmp.eq.s32.totalorder %s495_s25, 1 }
   0xe   : > { %p799_p9 = por %p165_p6, %p49_p1  ;;  %p538_p13 = scmp.lt.s32.totalorder %s707_s23, 2 }
   0xf   : > { %s804_s7 = scalar_select %p40_p7, %s695_s20, %s42_s27  }
  0x10   : > { %p806_p11 = por %p171_p10, %p55_p3  ;;  %s203_s9 = sand.u32 1, %s695_s20  }
  0x11   : > { %s498_s10 = sshll.u32 %s203_s9, 4  ;;  %s511_s11 = sshll.u32 %s703_s22, 8 }
  0x12   : > { %s215_s14 = scalar_lea.hbm %s909_s0, %s511_s11  ;;  %s207_s15 = scalar_lea.vmem [#allocation2], %s498_s10 }
  0x13   : > { %s216_s16 = sshll.u32 %s207_s15, 4  ;;  %p819_p0 = pnand %p538_p13, %p789_p4  ;;  %s217_s16 = int_to_ptr.vmem [resolvable:$true] %s216_s16 }
  0x14   : > { %p501_p1 = scmp.ge.s32.totalorder %s707_s23, 1  ;;  %s204_s24 = scalar_lea.sflag [#allocation3], %s203_s9 }
  0x15   : > { %p601_p2 = pneg %p819_p0  ;;  %s612_s25 = scalar_lea.vmem %s217_s16, 256 }
  0x16   : > { %p613_p3 = scmp.ne.s32.totalorder %s217_s16, %s612_s25  ;;  %s709_s27 = smov [#allocation2]  }
  0x17   : > { %s617_s29 = sshll.u32 %s709_s27, 4  ;;  %s618_s29 = int_to_ptr.vmem [resolvable:$false] %s617_s29 }
  0x18   : > { %p615_p5 = pnand %p613_p3, %p601_p2  ;;  %s619_s10 = scalar_lea.vmem %s618_s29, 512 }
  0x19   : > { %p620_p7 = scmp.lt.s32.totalorder %s217_s16, %s618_s29  ;;  %p621_p10 = scmp.lt.s32.totalorder %s619_s10, %s612_s25 }
  0x1a   : > { %p616_p6 = pneg %p615_p5 }
  0x1b   : > { %p622_p12 = por %p621_p10, %p620_p7 }
  0x1d   : > { %p623_p4 = pnand %p622_p12, %p616_p6 }
  0x1f   : > { %626 = shalt.err (!%p623_p4)
}
  0x20   : > { %s710_s28 = smov 128   ;;  %s711_s9 = smov 8  }
  0x21   : > { %533 = dma.hbm_to_vmem [thread:$0]  (!%p819_p0), %s215_s14, 256, %s217_s16, %s204_s24, %s710_s28, %s710_s28, %s711_s9  }
  0x22   : > { %p224_p13 = scmp.lt.s32.totalorder %s707_s23, 3 }
  0x24   : > { %p225_p2 = pnand %p501_p1, %p224_p13 }
  0x25   : > { %s832_s11 = sand.u32 (!%p225_p2), 1, %s691_s19  }
  0x26   : > { %228 = sbr.rel (%p225_p2) target bundleno = 390 (0x186), region = 40  ;;  %s502_s12 = sshll.u32 (!%p225_p2), %s832_s11, 4 }
  0x27   : > { %s231_s13 = scalar_lea.sflag (!%p225_p2), [#allocation3], %s832_s11  ;;  %s234_s15 = scalar_lea.vmem (!%p225_p2), [#allocation2], %s502_s12 }
  0x2b   : > { %678 = dma.done.wait (%p795_p8), %s231_s13, 256  }
  0x2c   : > { %680 = vsyncadd (%p795_p8), %s231_s13, 4294967040  ;;  %v712_v0 = vmov 0.0   ;;  %v266_v1 = vld [vmem:[%s234_s15] sm:$0xff]  ;;  %v267_v2 = vld [vmem:[%s234_s15 + $0x8] sm:$0xff]  ;;  %s713_s14 = smov 127   ;;  %s714_s16 = smov 126   ;;  %v335_v44 = vlaneseq }
  0x2d   : > { %516 = vmatprep.subr.bf16.mxu0 %v712_v0  ;;  %v504_v3 = vcombine.low %v266_v1, %v267_v2  ;;  %v292_v4 = vunpack.c.h.bf16 %v266_v1  ;;  %v294_v5 = vunpack.c.h.bf16 %v267_v2  ;;  %v505_v6 = vcombine.high %v266_v1, %v267_v2  ;;  %v263_v26 = vld [vmem:[%s911_s2] sm:$0xff]  ;;  %s503_s9 = sshll.u32 %s832_s11, 3  ;;  %s508_s12 = sshll.u32 %s699_s21, 7 }
  0x2e   : > { %vm715_vm0 = vmmov 0   ;;  %v291_v7 = vunpack.c.l.bf16 %v266_v1  ;;  %v293_v8 = vunpack.c.l.bf16 %v267_v2  ;;  %vm302_vm1 = vcmask 15360   ;;  %v264_v27 = vld [vmem:[%s912_s3] sm:$0xff]  ;;  %s260_s13 = scalar_lea.vmem [#allocation5], %s503_s9  ;;  %s867_s30 = scalar_lea.hbm %s914_s5, %s508_s12 }
  0x2f   : > { %277 = vrot.lane.b32.xlu1 %v504_v3, %s713_s14  ;;  %284 = vrot.lane.b32.xlu0 %v504_v3, %s714_s16  ;;  %v303_v9 = vsel %vm302_vm1, %v292_v4, 0.0  ;;  %v304_v10 = vsel %vm302_vm1, %v294_v5, 0.0  ;;  %v716_v12 = vmov 0   ;;  %v265_v28 = vld [vmem:[%s913_s4] sm:$0xff]  ;;  %vm288_vm2 = vcmask 1031168   ;;  %s412_s15 = sshll.u32 %s260_s13, 4  ;;  %s413_s15 = int_to_ptr.vmem [resolvable:$true] %s412_s15 }
  0x30   : > { %522 = vmatprep.mubr.msk.bf16.mxu0 %vm715_vm0, %v712_v0  ;;  %v295_v11 = vadd.f32 %v293_v8, %v291_v7  ;;  %595 = vset.pattern.permute.xlu0 %v716_v12  ;;  %v305_v13 = vadd.f32 %v304_v10, %v303_v9  ;;  %vm281_vm3 = vcmask 1039360   ;;  %v262_v35 = vld [vmem:[%s910_s1] sm:$0xf]  ;;  %vm340_vm4 = vcmask 392192   ;;  %s398_s17 = scalar_lea.sflag [#allocation4], %s832_s11  ;;  %s627_s24 = scalar_lea.vmem %s413_s15, 128 }
  0x31   : > { %596 = vset.pattern.permute.xlu1 %v716_v12  ;;  %v336_v45 = vshrl.u32 %v335_v44, 7  ;;  %p628_p8 = scmp.ne.s32.totalorder %s413_s15, %s627_s24  ;;  %s717_s21 = smov [#allocation5]  }
  0x32   : > { %v296_v14 = vrot.slane %v295_v11, 4  ;;  %v306_v15 = vrot.slane %v305_v13, 4  ;;  %s631_s25 = sshll.u32 %s717_s21, 4  ;;  %s632_s25 = int_to_ptr.vmem [resolvable:$false] %s631_s25 }
  0x33   : > { %279 = vrot.lane.b32.xlu1 %v505_v6, %s713_s14  ;;  %286 = vrot.lane.b32.xlu0 %v505_v6, %s714_s16  ;;  %v337_v46 = vsub.s32 0, %v336_v45  ;;  %p629_p12 = pnand %p628_p8, %p799_p9  ;;  %s633_s27 = scalar_lea.vmem %s632_s25, 256 }
  0x34   : > { %v297_v16 = vadd.f32 %v296_v14, %v295_v11  ;;  %v307_v17 = vadd.f32 %v306_v15, %v305_v13  ;;  %p634_p1 = scmp.lt.s32.totalorder %s413_s15, %s632_s25  ;;  %p635_p3 = scmp.lt.s32.totalorder %s633_s27, %s627_s24 }
  0x35   : > { %p630_p0 = pneg %p629_p12 }
  0x36   : > { %v298_v18 = vrot.slane %v297_v16, 2  ;;  %v308_v19 = vrot.slane %v307_v17, 2  ;;  %p636_p5 = por %p635_p3, %p634_p1 }
  0x38   : > { %v299_v20 = vadd.f32 %v298_v18, %v297_v16  ;;  %v309_v21 = vadd.f32 %v308_v19, %v307_v17  ;;  %p637_p6 = pnand %p636_p5, %p630_p0 }
  0x3a   : > { %v300_v22 = vrot.slane %v299_v20, 1  ;;  %v310_v23 = vrot.slane %v309_v21, 1 }
  0x3c   : > { %v301_v24 = vadd.f32 %v300_v22, %v299_v20  ;;  %v311_v25 = vadd.f32 %v310_v23, %v309_v21 }
  0x3e   : > { %314 = vrot.lane.b32.xlu0 %v301_v24, %s713_s14  ;;  %316 = vrot.lane.b32.xlu1 %v311_v25, %s713_s14 }
  0x42   : > { %322 = vrot.lane.b32.xlu0 %v301_v24, %s714_s16  ;;  %324 = vrot.lane.b32.xlu1 %v311_v25, %s714_s16 }
  0x46   : > { %332 = vperm.xlu0 %595, %v263_v26   ;;  %386 = vperm.xlu1 %596, %v264_v27  }
  0x4a   : > { %392 = vperm.xlu1 %596, %v265_v28  }
  0xa1   : > { %v278_v29 = vpop.permute.xlu1 %277  ;;  %v285_v30 = vpop.permute.xlu0 %284 }
  0xa5   : > { %v287_v31 = vpop.permute.xlu0 %286  ;;  %v280_v33 = vpop.permute.xlu1 %279 }
  0xa6   : > { %v289_v32 = vsel %vm288_vm2, %v285_v30, %v287_v31  ;;  %v282_v34 = vsel %vm281_vm3, %v278_v29, %v280_v33 }
  0xa7   : > { %517 = vmatpush3.bf16.msra.mxu0 %v289_v32 }
  0xa8   : > { %518 = vmatprep.subr.bf16.mxu0 %v712_v0 }
  0xab   : > { %519 = vmatpush3.bf16.msra.mxu0 %v282_v34 }
  0xac   : > { %520 = vmatprep.subr.bf16.mxu0 %v712_v0 }
  0xaf   : > { %521 = vmatpush3.bf16.msra.mxu0 %v504_v3 }
  0xb0   : > { %v317_v36 = vpop.permute.xlu1 %316  ;;  %v315_v37 = vpop.permute.xlu0 %314 }
  0xb1   : > { %v319_v38 = vsel %vm281_vm3, %v315_v37, %v317_v36 }
  0xb2   : > { %523 = vmatmul.mubr.msk.bf16.vlgmr.msra.gmra.mxu0 %vm340_vm4, %v262_v35  ;;  %v321_v39 = vadd.f32 %v319_v38, %v301_v24 }
  0xb4   : > { %v325_v40 = vpop.permute.xlu1 %324  ;;  %v323_v41 = vpop.permute.xlu0 %322 }
  0xb5   : > { %v327_v42 = vsel %vm288_vm2, %v323_v41, %v325_v40 }
  0xb6   : > { %v329_v43 = vadd.f32 %v327_v42, %v321_v39 }
  0xb8   : > { %v338_v47 = vrot.slane %v329_v43, %v337_v46 }
  0xc1   : > { %v333_v48 = vpop.permute.xlu0 %332  ;;  %v387_v49 = vpop.permute.xlu1 %386 }
  0xc2   : > { %v339_v50 = vmul.f32 %v338_v47, %v333_v48 }
  0xc5   : > { %v393_v55 = vpop.permute.xlu1 %392 }
 0x172   : > { %v378_v51 = vpop.f32.mrf.mxu0 }
 0x173   : > { %v379_v52 = vadd.f32 %v378_v51, %v339_v50 }
 0x174   : > { %v524_v53 = vpop.f32.mrf.mxu0 }
 0x175   : > { %v389_v54 = vmul.f32 %v387_v49, %v379_v52 }
 0x176   : > { %v381_v56 = vpop.f32.mrf.mxu0 }
 0x177   : > { %v395_v57 = vadd.f32 %v393_v55, %v389_v54 }
 0x178   : > { %v525_v58 = vpop.f32.mrf.mxu0 }
 0x179   : > { %396 = vst [vmem:[%s260_s13] sm:$0xff] %v395_v57 }
 0x17a   : > { %640 = shalt.err (!%p637_p6)
}
 0x17b   : > { %s641_s29 = scalar_lea.hbm %s867_s30, 128  ;;  %s645_s28 = scalar_lea.hbm %s914_s5, 256 }
 0x17c   : > { %p642_p7 = scmp.ne.s32.totalorder %s867_s30, %s641_s29  ;;  %p646_p13 = scmp.lt.s32.totalorder %s867_s30, %s914_s5 }
 0x17d   : > { %p647_p2 = scmp.lt.s32.totalorder %s645_s28, %s641_s29 }
 0x17e   : > { %p643_p10 = pnand %p642_p7, %p799_p9 }
 0x17f   : > { %p648_p8 = por %p647_p2, %p646_p13 }
 0x180   : > { %p644_p4 = pneg %p643_p10 }
 0x182   : > { %p649_p12 = pnand %p648_p8, %p644_p4 }
 0x184   : > { %652 = shalt.err (!%p649_p12)
}
 0x185   : > { %528 = dma.vmem_to_hbm [thread:$0]  (%p799_p9), %s413_s15, 128, %s867_s30, %s398_s17  }
 0x186 PF: > { %s424_s13 = sand.u32 1, %s687_s18   ;;  %p920_p0 = scmp.ge.s32.totalorder %s707_s23, 2 }
 0x187   : > { %s425_s14 = scalar_lea.sflag [#allocation4], %s424_s13 }
 0x188   : > { %p535_p1 = pnand %p920_p0, %p806_p11 }
 0x18a   : > { %p536_p3 = pneg %p535_p1 }
 0x18c   : > { %682 = dma.done.wait (%p536_p3), %s425_s14, 128  }
 0x18d   : > { %684 = vsyncadd (%p536_p3), %s425_s14, 4294967168  ;;  %s21_s23 = sadd.s32 1, %s707_s23   ;;  %s921_s18 = smov %s691_s19 }
 0x18e   : > { %p18_p5 = scmp.ge.s32.totalorder %s21_s23, 4   ;;  %s922_s19 = smov %s695_s20 }
 0x18f   : > { %s923_s20 = smov %s804_s7  ;;  %s924_s21 = smov %s703_s22 }
 0x190   : > { %s925_s22 = smov %s927_s26  ;;  %20 = sbr.rel (!%p18_p5) target bundleno = 6 (0x6), region = 85 }
 0x195   :  { %430 = vsyncpa [#allocation3], 1 }
 0x196   :  { %432 = vsyncpa [#allocation3 + $0x1], 1 }
 0x197   :  { %433 = vsyncpa [#allocation4], 1 }
 0x198   :  { %435 = vsyncpa [#allocation4 + $0x1], 1 }

</bundles_post_ra>
